<compile_context>
chip_gen: v7x
topology: tpu7x:2x2x1
jax: 0.10.0
libtpu: 0.0.40
codegen_flags: <defaults>
</compile_context>

<pallas_src>
import numpy as np
import jax
import jax.numpy as jnp
from jax.experimental import pallas as pl
from jax.experimental.pallas import tpu as pltpu


# ----------------------------------------------------------------------------
# Glue: PyTorch-style bilinear (align_corners=False) interpolation matrix.
# ----------------------------------------------------------------------------
def make_interp_matrix(out_size: int, in_size: int) -> np.ndarray:
    """Row-interpolation matrix W (out_size, in_size): out = W @ in."""
    w = np.zeros((out_size, in_size), dtype=np.float32)
    if in_size == 1:
        w[:, 0] = 1.0
        return w
    scale = in_size / out_size
    for i in range(out_size):
        src = (i + 0.5) * scale - 0.5
        src = max(src, 0.0)                       # PyTorch clamps negative src
        i0 = min(int(np.floor(src)), in_size - 1)
        i1 = min(i0 + 1, in_size - 1)
        lam = src - i0
        w[i, i0] += 1.0 - lam
        w[i, i1] += lam
    return w


# ----------------------------------------------------------------------------
# Batch-block sizing: keep the double-buffered working set inside a budget
# that is safe even on v7x (64 MiB physical VMEM).
# ----------------------------------------------------------------------------
def _pick_batch_block(n, z_cshw, z_itemsizes, out_h, out_w,
                      max_block=8, budget_bytes=24 * 2**20):
    def estimate(b):
        total = 0
        live = 0
        for (c, h, w), isz in zip(z_cshw, z_itemsizes):
            total += 2 * b * c * h * w * isz              # double-buffered z block
            total += 2 * (out_h * h + w * out_w) * 4      # Wh / Ww buffers
            live = max(live, b * c * h * w * 4 + b * (h * w + out_h * w) * 4)
        total += 2 * b * out_h * out_w * 4                # double-buffered output block
        total += live + 2 * b * out_h * out_w * 4         # in-kernel f32 temps + acc/up
        return total

    best = 1
    for b in range(min(max_block, n), 0, -1):
        if n % b == 0 and estimate(b) <= budget_bytes:
            best = b
            break
    return best, estimate(best)


# ----------------------------------------------------------------------------
# Pallas kernel: one grid step per batch block of B images.
# ----------------------------------------------------------------------------
def _build_kernel(num_scales: int, block_b: int, out_h: int, out_w: int, in_hw):
    def kernel(*refs):
        z_refs = refs[:num_scales]
        wh_refs = refs[num_scales:2 * num_scales]
        ww_refs = refs[2 * num_scales:3 * num_scales]
        out_ref = refs[3 * num_scales]

        acc = None
        for s in range(num_scales):
            h_in, w_in = in_hw[s]
            # Cast happens in-kernel (free on the VPU); no wrapper-side copy.
            z = z_refs[s][...].astype(jnp.float32)            # (B, C, H_in, W_in)
            # Channel mean's 1/C is folded into Wh -> plain sum here.
            sq = jnp.sum(z * z, axis=1)                       # (B, H_in, W_in)
            # Concatenate batch along lanes: (H_in, B*W_in).  Static slices
            # + concat only (guaranteed to lower; no arbitrary transposes).
            sq_cat = jnp.concatenate([sq[b] for b in range(block_b)], axis=1)
            # H interpolation for the whole batch block: one big MXU call.
            u = jnp.dot(wh_refs[s][...], sq_cat,
                        preferred_element_type=jnp.float32)   # (H_out, B*W_in)
            # Re-stack the batch along rows: (B*H_out, W_in).
            u_rows = jnp.concatenate(
                [u[:, b * w_in:(b + 1) * w_in] for b in range(block_b)],
                axis=0)
            # W interpolation: second big MXU call for the whole block.
            up = jnp.dot(u_rows, ww_refs[s][...],
                         preferred_element_type=jnp.float32)  # (B*H_out, W_out)
            # Initialize accumulator from the first scale (no ones() pass).
            acc = up if acc is None else acc * up

        out_ref[...] = acc   # single full-block store (lane-dense when W_out % 128 == 0)

    return kernel


# ----------------------------------------------------------------------------
# Wrapper (equivalent of AnomalyMapGenerator.forward).
# ----------------------------------------------------------------------------
def anomaly_map_generator(z_dists, input_dims, mode: str = "all",
                          max_batch_block: int = 8):
    """z_dists: list of arrays (N, C_s, H_s, W_s); input_dims = (C, H, W)."""
    out_h, out_w = int(input_dims[1]), int(input_dims[2])
    if mode == "max":
        z_dists = z_dists[:1]
    num_scales = len(z_dists)
    n = int(z_dists[0].shape[0])

    in_hw = [(int(z.shape[2]), int(z.shape[3])) for z in z_dists]
    chans = [int(z.shape[1]) for z in z_dists]

    # Host-precomputed interpolation matrices; 1/C folded into Wh.
    whs = [jnp.asarray(make_interp_matrix(out_h, h) / float(c))
           for (h, _w), c in zip(in_hw, chans)]                      # (H_out, H_in)
    wws = [jnp.asarray(make_interp_matrix(out_w, w).T)
           for (_h, w) in in_hw]                                     # (W_in, W_out)

    block_b, vmem_est = _pick_batch_block(
        n, [(c, h, w) for c, (h, w) in zip(chans, in_hw)],
        [z.dtype.itemsize for z in z_dists], out_h, out_w,
        max_block=max_batch_block)

    in_specs = []
    for (h, w), c in zip(in_hw, chans):
        in_specs.append(pl.BlockSpec((block_b, c, h, w),
                                     lambda b: (b, 0, 0, 0)))
    for wh in whs:   # constant index_map: weights stay resident across the grid
        in_specs.append(pl.BlockSpec(tuple(wh.shape), lambda b: (0, 0)))
    for ww in wws:
        in_specs.append(pl.BlockSpec(tuple(ww.shape), lambda b: (0, 0)))

    kernel = _build_kernel(num_scales, block_b, out_h, out_w, in_hw)

    # Explicit VMEM limit: at least the default-ish 32 MiB, never above what
    # v7x can physically back.
    vmem_limit = int(min(64 * 2**20, max(32 * 2**20, 2 * vmem_est)))

    out2d = pl.pallas_call(
        kernel,
        out_shape=jax.ShapeDtypeStruct((n * out_h, out_w), jnp.float32),
        grid_spec=pltpu.PrefetchScalarGridSpec(
            num_scalar_prefetch=0,
            grid=(n // block_b,),
            in_specs=in_specs,
            out_specs=pl.BlockSpec((block_b * out_h, out_w),
                                   lambda b: (b, 0)),
        ),
        compiler_params=pltpu.CompilerParams(
            dimension_semantics=("parallel",),
            vmem_limit_bytes=vmem_limit),
    )(*z_dists, *whs, *wws)   # NOTE: original dtypes go straight in (no f32 cast)

    # Free (contiguous) reshape back to the PyTorch (N, 1, H, W) layout.
    return out2d.reshape(n, 1, out_h, out_w)


# ----------------------------------------------------------------------------
# Pure numpy reference (PyTorch semantics) for a sanity check.
# ----------------------------------------------------------------------------
def _reference(z_dists, out_h, out_w, mode="all"):
    if mode == "max":
        z_dists = z_dists[:1]
    n = z_dists[0].shape[0]
    acc = np.ones((n, 1, out_h, out_w), dtype=np.float32)
    for z in z_dists:
        z = np.asarray(z, np.float32)
        mean_z = (z ** 2).mean(axis=1, keepdims=True)
        wh = make_interp_matrix(out_h, z.shape[2])
        ww = make_interp_matrix(out_w, z.shape[3])
        up = np.einsum("ha,ncab,wb->nchw", wh, mean_z, ww)
        acc *= up
    return acc


if __name__ == "__main__":
    # Small shapes consistent with CS-Flow: 3 z-scales at 16x16, 8x8, 4x4.
    key = jax.random.PRNGKey(0)
    k0, k1, k2 = jax.random.split(key, 3)
    batch, channels = 2, 4
    input_dims = (3, 16, 16)  # (C, H, W) of the original input image

    z0 = jax.random.normal(k0, (batch, channels, 16, 16), dtype=jnp.float32)
    z1 = jax.random.normal(k1, (batch, channels, 8, 8), dtype=jnp.float32)
    z2 = jax.random.normal(k2, (batch, channels, 4, 4), dtype=jnp.float32)
    z_dists = [z0, z1, z2]

    out = jax.block_until_ready(
        anomaly_map_generator(z_dists, input_dims, mode="all"))
    ref = _reference([np.asarray(z) for z in z_dists],
                     input_dims[1], input_dims[2], mode="all")
    assert out.shape == (batch, 1, input_dims[1], input_dims[2])
    np.testing.assert_allclose(np.asarray(out), ref, rtol=1e-4, atol=1e-5)

    # AnomalyMapMode.MAX path.
    out_max = jax.block_until_ready(
        anomaly_map_generator(z_dists, input_dims, mode="max"))
    ref_max = _reference([np.asarray(z) for z in z_dists],
                         input_dims[1], input_dims[2], mode="max")
    np.testing.assert_allclose(np.asarray(out_max), ref_max,
                               rtol=1e-4, atol=1e-5)

    # bf16 z goes straight into the kernel (no wrapper-side f32 cast).
    z_bf16 = [z.astype(jnp.bfloat16) for z in z_dists]
    out_bf = jax.block_until_ready(
        anomaly_map_generator(z_bf16, input_dims, mode="all"))
    ref_bf = _reference([np.asarray(z.astype(jnp.float32)) for z in z_bf16],
                        input_dims[1], input_dims[2], mode="all")
    np.testing.assert_allclose(np.asarray(out_bf), ref_bf, rtol=1e-4, atol=1e-5)

    print("KERNEL_OK")
</pallas_src>

<mosaic_0001>
module attributes {stable_mosaic.version = 11 : i64} {
  func.func @kernel(%arg0: i32, %arg1: memref<2x4x16x16xf32, #tpu.memory_space<vmem>>, %arg2: memref<2x4x8x8xf32, #tpu.memory_space<vmem>>, %arg3: memref<2x4x4x4xf32, #tpu.memory_space<vmem>>, %arg4: memref<16x16xf32, #tpu.memory_space<vmem>>, %arg5: memref<16x8xf32, #tpu.memory_space<vmem>>, %arg6: memref<16x4xf32, #tpu.memory_space<vmem>>, %arg7: memref<16x16xf32, #tpu.memory_space<vmem>>, %arg8: memref<8x16xf32, #tpu.memory_space<vmem>>, %arg9: memref<4x16xf32, #tpu.memory_space<vmem>>, %arg10: memref<32x16xf32, #tpu.memory_space<vmem>>) attributes {dimension_semantics = [#tpu.dimension_semantics<parallel>], iteration_bounds = array<i64: 1>, scalar_prefetch = 0 : i64, scratch_operands = 0 : i64, tpu.core_type = #tpu.core_type<tc>, window_params = [{transform_indices = @transform_0, window_bounds = array<i64: 2, 4, 16, 16>}, {transform_indices = @transform_1, window_bounds = array<i64: 2, 4, 8, 8>}, {transform_indices = @transform_2, window_bounds = array<i64: 2, 4, 4, 4>}, {pipeline_mode = #tpu.pipeline_mode<synchronous>, transform_indices = @transform_3, window_bounds = array<i64: 16, 16>}, {pipeline_mode = #tpu.pipeline_mode<synchronous>, transform_indices = @transform_4, window_bounds = array<i64: 16, 8>}, {pipeline_mode = #tpu.pipeline_mode<synchronous>, transform_indices = @transform_5, window_bounds = array<i64: 16, 4>}, {pipeline_mode = #tpu.pipeline_mode<synchronous>, transform_indices = @transform_6, window_bounds = array<i64: 16, 16>}, {pipeline_mode = #tpu.pipeline_mode<synchronous>, transform_indices = @transform_7, window_bounds = array<i64: 8, 16>}, {pipeline_mode = #tpu.pipeline_mode<synchronous>, transform_indices = @transform_8, window_bounds = array<i64: 4, 16>}, {transform_indices = @transform_9, window_bounds = array<i64: 32, 16>}]} {
    %c0 = arith.constant 0 : index
    %c0_0 = arith.constant 0 : index
    %c0_1 = arith.constant 0 : index
    %c0_2 = arith.constant 0 : index
    %0 = vector.load %arg1[%c0, %c0_0, %c0_1, %c0_2] : memref<2x4x16x16xf32, #tpu.memory_space<vmem>>, vector<2x4x16x16xf32>
    %1 = arith.mulf %0, %0 : vector<2x4x16x16xf32>
    %cst = arith.constant dense<0.000000e+00> : vector<2x16x16xf32>
    %2 = vector.multi_reduction <add>, %1, %cst [1] : vector<2x4x16x16xf32> to vector<2x16x16xf32>
    %3 = vector.extract_strided_slice %2 {offsets = [0, 0, 0], sizes = [1, 16, 16], strides = [1, 1, 1]} : vector<2x16x16xf32> to vector<1x16x16xf32>
    %4 = vector.shape_cast %3 : vector<1x16x16xf32> to vector<16x16xf32>
    %5 = vector.extract_strided_slice %2 {offsets = [1, 0, 0], sizes = [1, 16, 16], strides = [1, 1, 1]} : vector<2x16x16xf32> to vector<1x16x16xf32>
    %6 = vector.shape_cast %5 : vector<1x16x16xf32> to vector<16x16xf32>
    %7 = tpu.concatenate %4, %6 in 1 : vector<16x16xf32>, vector<16x16xf32> -> vector<16x32xf32>
    %c0_3 = arith.constant 0 : index
    %c0_4 = arith.constant 0 : index
    %8 = vector.load %arg4[%c0_3, %c0_4] : memref<16x16xf32, #tpu.memory_space<vmem>>, vector<16x16xf32>
    %cst_5 = arith.constant dense<0.000000e+00> : vector<16x32xf32>
    %9 = tpu.matmul %8, %7, %cst_5 {dimension_numbers = #tpu.dot_dimension_numbers<[1], [0], [0], [1], [0, 0, 1, 1], [], []>} : vector<16x16xf32>, vector<16x32xf32>, vector<16x32xf32> -> vector<16x32xf32>
    %10 = vector.extract_strided_slice %9 {offsets = [0, 0], sizes = [16, 16], strides = [1, 1]} : vector<16x32xf32> to vector<16x16xf32>
    %11 = vector.extract_strided_slice %9 {offsets = [0, 16], sizes = [16, 16], strides = [1, 1]} : vector<16x32xf32> to vector<16x16xf32>
    %12 = tpu.concatenate %10, %11 in 0 : vector<16x16xf32>, vector<16x16xf32> -> vector<32x16xf32>
    %c0_6 = arith.constant 0 : index
    %c0_7 = arith.constant 0 : index
    %13 = vector.load %arg7[%c0_6, %c0_7] : memref<16x16xf32, #tpu.memory_space<vmem>>, vector<16x16xf32>
    %cst_8 = arith.constant dense<0.000000e+00> : vector<32x16xf32>
    %14 = tpu.matmul %12, %13, %cst_8 {dimension_numbers = #tpu.dot_dimension_numbers<[1], [0], [0], [1], [0, 0, 1, 1], [], []>} : vector<32x16xf32>, vector<16x16xf32>, vector<32x16xf32> -> vector<32x16xf32>
    %c0_9 = arith.constant 0 : index
    %c0_10 = arith.constant 0 : index
    %c0_11 = arith.constant 0 : index
    %c0_12 = arith.constant 0 : index
    %15 = vector.load %arg2[%c0_9, %c0_10, %c0_11, %c0_12] : memref<2x4x8x8xf32, #tpu.memory_space<vmem>>, vector<2x4x8x8xf32>
    %16 = arith.mulf %15, %15 : vector<2x4x8x8xf32>
    %cst_13 = arith.constant dense<0.000000e+00> : vector<2x8x8xf32>
    %17 = vector.multi_reduction <add>, %16, %cst_13 [1] : vector<2x4x8x8xf32> to vector<2x8x8xf32>
    %18 = vector.extract_strided_slice %17 {offsets = [0, 0, 0], sizes = [1, 8, 8], strides = [1, 1, 1]} : vector<2x8x8xf32> to vector<1x8x8xf32>
    %19 = vector.shape_cast %18 : vector<1x8x8xf32> to vector<8x8xf32>
    %20 = vector.extract_strided_slice %17 {offsets = [1, 0, 0], sizes = [1, 8, 8], strides = [1, 1, 1]} : vector<2x8x8xf32> to vector<1x8x8xf32>
    %21 = vector.shape_cast %20 : vector<1x8x8xf32> to vector<8x8xf32>
    %22 = tpu.concatenate %19, %21 in 1 : vector<8x8xf32>, vector<8x8xf32> -> vector<8x16xf32>
    %c0_14 = arith.constant 0 : index
    %c0_15 = arith.constant 0 : index
    %23 = vector.load %arg5[%c0_14, %c0_15] : memref<16x8xf32, #tpu.memory_space<vmem>>, vector<16x8xf32>
    %cst_16 = arith.constant dense<0.000000e+00> : vector<16x16xf32>
    %24 = tpu.matmul %23, %22, %cst_16 {dimension_numbers = #tpu.dot_dimension_numbers<[1], [0], [0], [1], [0, 0, 1, 1], [], []>} : vector<16x8xf32>, vector<8x16xf32>, vector<16x16xf32> -> vector<16x16xf32>
    %25 = vector.extract_strided_slice %24 {offsets = [0, 0], sizes = [16, 8], strides = [1, 1]} : vector<16x16xf32> to vector<16x8xf32>
    %26 = vector.extract_strided_slice %24 {offsets = [0, 8], sizes = [16, 8], strides = [1, 1]} : vector<16x16xf32> to vector<16x8xf32>
    %27 = tpu.concatenate %25, %26 in 0 : vector<16x8xf32>, vector<16x8xf32> -> vector<32x8xf32>
    %c0_17 = arith.constant 0 : index
    %c0_18 = arith.constant 0 : index
    %28 = vector.load %arg8[%c0_17, %c0_18] : memref<8x16xf32, #tpu.memory_space<vmem>>, vector<8x16xf32>
    %cst_19 = arith.constant dense<0.000000e+00> : vector<32x16xf32>
    %29 = tpu.matmul %27, %28, %cst_19 {dimension_numbers = #tpu.dot_dimension_numbers<[1], [0], [0], [1], [0, 0, 1, 1], [], []>} : vector<32x8xf32>, vector<8x16xf32>, vector<32x16xf32> -> vector<32x16xf32>
    %30 = arith.mulf %14, %29 : vector<32x16xf32>
    %c0_20 = arith.constant 0 : index
    %c0_21 = arith.constant 0 : index
    %c0_22 = arith.constant 0 : index
    %c0_23 = arith.constant 0 : index
    %31 = vector.load %arg3[%c0_20, %c0_21, %c0_22, %c0_23] : memref<2x4x4x4xf32, #tpu.memory_space<vmem>>, vector<2x4x4x4xf32>
    %32 = arith.mulf %31, %31 : vector<2x4x4x4xf32>
    %cst_24 = arith.constant dense<0.000000e+00> : vector<2x4x4xf32>
    %33 = vector.multi_reduction <add>, %32, %cst_24 [1] : vector<2x4x4x4xf32> to vector<2x4x4xf32>
    %34 = vector.extract_strided_slice %33 {offsets = [0, 0, 0], sizes = [1, 4, 4], strides = [1, 1, 1]} : vector<2x4x4xf32> to vector<1x4x4xf32>
    %35 = vector.shape_cast %34 : vector<1x4x4xf32> to vector<4x4xf32>
    %36 = vector.extract_strided_slice %33 {offsets = [1, 0, 0], sizes = [1, 4, 4], strides = [1, 1, 1]} : vector<2x4x4xf32> to vector<1x4x4xf32>
    %37 = vector.shape_cast %36 : vector<1x4x4xf32> to vector<4x4xf32>
    %38 = tpu.concatenate %35, %37 in 1 : vector<4x4xf32>, vector<4x4xf32> -> vector<4x8xf32>
    %c0_25 = arith.constant 0 : index
    %c0_26 = arith.constant 0 : index
    %39 = vector.load %arg6[%c0_25, %c0_26] : memref<16x4xf32, #tpu.memory_space<vmem>>, vector<16x4xf32>
    %cst_27 = arith.constant dense<0.000000e+00> : vector<16x8xf32>
    %40 = tpu.matmul %39, %38, %cst_27 {dimension_numbers = #tpu.dot_dimension_numbers<[1], [0], [0], [1], [0, 0, 1, 1], [], []>} : vector<16x4xf32>, vector<4x8xf32>, vector<16x8xf32> -> vector<16x8xf32>
    %41 = vector.extract_strided_slice %40 {offsets = [0, 0], sizes = [16, 4], strides = [1, 1]} : vector<16x8xf32> to vector<16x4xf32>
    %42 = vector.extract_strided_slice %40 {offsets = [0, 4], sizes = [16, 4], strides = [1, 1]} : vector<16x8xf32> to vector<16x4xf32>
    %43 = tpu.concatenate %41, %42 in 0 : vector<16x4xf32>, vector<16x4xf32> -> vector<32x4xf32>
    %c0_28 = arith.constant 0 : index
    %c0_29 = arith.constant 0 : index
    %44 = vector.load %arg9[%c0_28, %c0_29] : memref<4x16xf32, #tpu.memory_space<vmem>>, vector<4x16xf32>
    %cst_30 = arith.constant dense<0.000000e+00> : vector<32x16xf32>
    %45 = tpu.matmul %43, %44, %cst_30 {dimension_numbers = #tpu.dot_dimension_numbers<[1], [0], [0], [1], [0, 0, 1, 1], [], []>} : vector<32x4xf32>, vector<4x16xf32>, vector<32x16xf32> -> vector<32x16xf32>
    %46 = arith.mulf %30, %45 : vector<32x16xf32>
    %c0_31 = arith.constant 0 : index
    %c0_32 = arith.constant 0 : index
    %47 = vector.load %arg10[%c0_31, %c0_32] : memref<32x16xf32, #tpu.memory_space<vmem>>, vector<32x16xf32>
    tpu.vector_store %arg10[%c0_31, %c0_32], %46 {strides = array<i32>} : memref<32x16xf32, #tpu.memory_space<vmem>>, vector<32x16xf32>,
    return
  }
  func.func @transform_0(%arg0: i32) -> (i32, i32, i32, i32) {
    %c0_i32 = arith.constant 0 : i32
    %c0_i32_0 = arith.constant 0 : i32
    %c0_i32_1 = arith.constant 0 : i32
    %c0_i32_2 = arith.constant 0 : i32
    return %arg0, %c0_i32, %c0_i32_0, %c0_i32_1 : i32, i32, i32, i32
  }
  func.func @transform_1(%arg0: i32) -> (i32, i32, i32, i32) {
    %c0_i32 = arith.constant 0 : i32
    %c0_i32_0 = arith.constant 0 : i32
    %c0_i32_1 = arith.constant 0 : i32
    %c0_i32_2 = arith.constant 0 : i32
    return %arg0, %c0_i32, %c0_i32_0, %c0_i32_1 : i32, i32, i32, i32
  }
  func.func @transform_2(%arg0: i32) -> (i32, i32, i32, i32) {
    %c0_i32 = arith.constant 0 : i32
    %c0_i32_0 = arith.constant 0 : i32
    %c0_i32_1 = arith.constant 0 : i32
    %c0_i32_2 = arith.constant 0 : i32
    return %arg0, %c0_i32, %c0_i32_0, %c0_i32_1 : i32, i32, i32, i32
  }
  func.func @transform_3(%arg0: i32) -> (i32, i32) {
    %c0_i32 = arith.constant 0 : i32
    %c0_i32_0 = arith.constant 0 : i32
    %c0_i32_1 = arith.constant 0 : i32
    return %c0_i32, %c0_i32_0 : i32, i32
  }
  func.func @transform_4(%arg0: i32) -> (i32, i32) {
    %c0_i32 = arith.constant 0 : i32
    %c0_i32_0 = arith.constant 0 : i32
    %c0_i32_1 = arith.constant 0 : i32
    return %c0_i32, %c0_i32_0 : i32, i32
  }
  func.func @transform_5(%arg0: i32) -> (i32, i32) {
    %c0_i32 = arith.constant 0 : i32
    %c0_i32_0 = arith.constant 0 : i32
    %c0_i32_1 = arith.constant 0 : i32
    return %c0_i32, %c0_i32_0 : i32, i32
  }
  func.func @transform_6(%arg0: i32) -> (i32, i32) {
    %c0_i32 = arith.constant 0 : i32
    %c0_i32_0 = arith.constant 0 : i32
    %c0_i32_1 = arith.constant 0 : i32
    return %c0_i32, %c0_i32_0 : i32, i32
  }
  func.func @transform_7(%arg0: i32) -> (i32, i32) {
    %c0_i32 = arith.constant 0 : i32
    %c0_i32_0 = arith.constant 0 : i32
    %c0_i32_1 = arith.constant 0 : i32
    return %c0_i32, %c0_i32_0 : i32, i32
  }
  func.func @transform_8(%arg0: i32) -> (i32, i32) {
    %c0_i32 = arith.constant 0 : i32
    %c0_i32_0 = arith.constant 0 : i32
    %c0_i32_1 = arith.constant 0 : i32
    return %c0_i32, %c0_i32_0 : i32, i32
  }
  func.func @transform_9(%arg0: i32) -> (i32, i32) {
    %c0_i32 = arith.constant 0 : i32
    %c0_i32_0 = arith.constant 0 : i32
    return %arg0, %c0_i32 : i32, i32
  }
}

</mosaic_0001>

<bundles_post_ra>
// kernel: tpu_custom_call.1
= control target key start
LH: loop header
LB: loop body
LE: loop exit
PB: predicated region body
PF: predicated region fallthrough
CT: control target
= control target key end

     0   :  { %14 = vsyncpa [#allocation3], 0  ;;  %s1199_s0 = inlined_call_operand.hbm [shape: f32[2,4,16,16], index: 0, kind: input, shape index: {}]   ;;  %s1200_s1 = inlined_call_operand.hbm [shape: f32[2,4,8,8], index: 1, kind: input, shape index: {}]   ;;  %s1201_s2 = inlined_call_operand.vmem [shape: f32[2,4,4,4], index: 2, kind: input, shape index: {}]   ;;  %s1202_s3 = inlined_call_operand.vmem [shape: f32[16,16], index: 3, kind: input, shape index: {}]   ;;  %s1203_s4 = inlined_call_operand.vmem [shape: f32[16,8], index: 4, kind: input, shape index: {}]   ;;  %s1204_s5 = inlined_call_operand.vmem [shape: f32[16,4], index: 5, kind: input, shape index: {}]   ;;  %s1205_s6 = inlined_call_operand.vmem [shape: f32[16,16], index: 6, kind: input, shape index: {}]   ;;  %s1206_s7 = inlined_call_operand.hbm [shape: f32[8,16], index: 7, kind: input, shape index: {}]   ;;  %s1207_s8 = inlined_call_operand.vmem [shape: f32[4,16], index: 8, kind: input, shape index: {}]   ;;  %s1208_s9 = inlined_call_operand.vmem [shape: f32[32,16], index: 9, kind: output, shape index: {}]  }
   0x1   :  { %15 = vsyncpa [#allocation5], 0  ;;  %s972_s30 = smov [#allocation4]   ;;  %s973_s11 = smov [#allocation2]  }
   0x2   :  { %s33_s10 = sshll.u32 %s972_s30, 4  ;;  %s21_s12 = sshll.u32 %s973_s11, 4  ;;  %s34_s10 = int_to_ptr.vmem [resolvable:$true] %s33_s10  ;;  %s1032_s12 = int_to_ptr.vmem [resolvable:$true] %s21_s12 }
   0x3   :  { %s902_s15 = scalar_lea.hbm %s1200_s1, 1024 }
   0x4   :  { %p903_p0 = scmp.ne.s32.totalorder %s1200_s1, %s902_s15  ;;  %p906_p1 = scmp.lt.u32.totalorder %s902_s15, %s1200_s1 }
   0x6   :  { %p908_p2 = pnand %p906_p1, %p903_p0 }
   0x8   :  { %911 = shalt.err (!%p908_p2)
}
   0x9   :  { %s912_s20 = scalar_lea.vmem %s34_s10, 1024  ;;  %p917_p4 = scmp.lt.s32.totalorder %s34_s10, %s34_s10 }
   0xa   :  { %p913_p3 = scmp.ne.s32.totalorder %s34_s10, %s912_s20  ;;  %p918_p5 = scmp.lt.s32.totalorder %s912_s20, %s912_s20 }
   0xc   :  { %p919_p6 = por %p918_p5, %p917_p4 }
   0xe   :  { %p920_p7 = pnand %p919_p6, %p913_p3 }
  0x10   :  { %923 = shalt.err (!%p920_p7)
}
  0x11   :  { %s974_s21 = smov 128   ;;  %s975_s22 = smov 8  }
  0x12   :  { %39 = dma.hbm_to_vmem [thread:$0]  %s1200_s1, 1024, %s34_s10, [#allocation5], %s974_s21, %s974_s21, %s975_s22  }
  0x13   :  { %s924_s27 = scalar_lea.hbm %s1199_s0, 2048 }
  0x14   :  { %p925_p8 = scmp.ne.s32.totalorder %s1199_s0, %s924_s27  ;;  %p928_p9 = scmp.lt.u32.totalorder %s924_s27, %s1199_s0 }
  0x16   :  { %p930_p10 = pnand %p928_p9, %p925_p8 }
  0x18   :  { %933 = shalt.err (!%p930_p10)
}
  0x19   :  { %s934_s13 = scalar_lea.vmem %s1032_s12, 2048  ;;  %p939_p12 = scmp.lt.s32.totalorder %s1032_s12, %s1032_s12 }
  0x1a   :  { %p935_p11 = scmp.ne.s32.totalorder %s1032_s12, %s934_s13  ;;  %p940_p13 = scmp.lt.s32.totalorder %s934_s13, %s934_s13 }
  0x1c   :  { %p941_p0 = por %p940_p13, %p939_p12 }
  0x1e   :  { %p942_p1 = pnand %p941_p0, %p935_p11 }
  0x20   :  { %945 = shalt.err (!%p942_p1)
}
  0x21   :  { %27 = dma.hbm_to_vmem [thread:$0]  %s1199_s0, 2048, %s1032_s12, [#allocation3], %s974_s21, %s974_s21, %s975_s22  }
  0x22   :  { %s976_s14 = smov [#allocation6]   ;;  %s946_s18 = scalar_lea.hbm %s1206_s7, 128 }
  0x23   :  { %s56_s15 = sshll.u32 %s976_s14, 4  ;;  %p947_p2 = scmp.ne.s32.totalorder %s1206_s7, %s946_s18  ;;  %s57_s15 = int_to_ptr.vmem [resolvable:$true] %s56_s15 }
  0x24   :  { %p950_p3 = scmp.lt.u32.totalorder %s946_s18, %s1206_s7 }
  0x26   :  { %p952_p4 = pnand %p950_p3, %p947_p2 }
  0x28   :  { %955 = shalt.err (!%p952_p4)
}
  0x29   :  { %s956_s25 = scalar_lea.vmem %s57_s15, 128  ;;  %p961_p6 = scmp.lt.s32.totalorder %s57_s15, %s57_s15 }
  0x2a   :  { %p957_p5 = scmp.ne.s32.totalorder %s57_s15, %s956_s25  ;;  %p962_p7 = scmp.lt.s32.totalorder %s956_s25, %s956_s25 }
  0x2c   :  { %p963_p8 = por %p962_p7, %p961_p6 }
  0x2e   :  { %p964_p9 = pnand %p963_p8, %p957_p5 }
  0x30   :  { %967 = shalt.err (!%p964_p9)
}
  0x31   :  { %59 = dma.hbm_to_vmem [thread:$0]  %s1206_s7, 128, %s57_s15, [#allocation5]  }
  0x32   :  { %968 = dma.done.wait [#allocation3], 2048  }
  0x33   :  { %969 = vsyncadd [#allocation3], 4294965248 }
  0x34   :  { %970 = dma.done.wait [#allocation5], 1152  }
  0x35   :  { %971 = vsyncadd [#allocation5], 4294966144  ;;  %v79_v0 = vld [vmem:[#allocation2 + $0x40] sm:$0xff]  ;;  %v80_v1 = vld [vmem:[#allocation2 + $0x48] sm:$0xff]  ;;  %vm103_vm0 = vcmask 130048   ;;  %vm342_vm1 = vcmask 64512  }
  0x36   :  { %v81_v2 = vld [vmem:[#allocation2 + $0x50] sm:$0xff]  ;;  %v82_v3 = vld [vmem:[#allocation2 + $0x58] sm:$0xff]  ;;  %v83_v4 = vld [vmem:[#allocation2 + $0x60] sm:$0xff]  ;;  %v95_v6 = vmul.f32 %v79_v0, %v79_v0  ;;  %v96_v7 = vmul.f32 %v80_v1, %v80_v1  ;;  %s977_s26 = smov 16   ;;  %vm565_vm2 = vcmask 27648   ;;  %s978_s20 = smov 112  }
  0x37   :  { %v84_v5 = vld [vmem:[#allocation2 + $0x68] sm:$0xff]  ;;  %v97_v8 = vmul.f32 %v81_v2, %v81_v2  ;;  %v85_v9 = vld [vmem:[#allocation2 + $0x70] sm:$0xff]  ;;  %v86_v10 = vld [vmem:[#allocation2 + $0x78] sm:$0xff]  ;;  %v98_v11 = vmul.f32 %v82_v3, %v82_v3  ;;  %v99_v12 = vmul.f32 %v83_v4, %v83_v4  ;;  %s979_s23 = smov 4   ;;  %s980_s24 = smov 120   ;;  %vm584_vm3 = vcmask 31744  }
  0x38   :  { %v100_v13 = vmul.f32 %v84_v5, %v84_v5  ;;  %v101_v14 = vmul.f32 %v85_v9, %v85_v9  ;;  %v102_v15 = vmul.f32 %v86_v10, %v86_v10  ;;  %v118_v16 = vsel %vm103_vm0, %v95_v6, 0.0  ;;  %v330_v18 = vld [vmem:[#allocation4 + $0x20] sm:$0xff]  ;;  %v331_v19 = vld [vmem:[#allocation4 + $0x28] sm:$0xff]  ;;  %v332_v20 = vld [vmem:[#allocation4 + $0x30] sm:$0xff] }
  0x39   :  { %v119_v17 = vsel %vm103_vm0, %v97_v8, 0.0  ;;  %v121_v22 = vsel %vm103_vm0, %v99_v12, 0.0  ;;  %v125_v23 = vsel %vm103_vm0, %v96_v7, 0.0  ;;  %v126_v24 = vsel %vm103_vm0, %v98_v11, 0.0  ;;  %v333_v25 = vld [vmem:[#allocation4 + $0x38] sm:$0xff]  ;;  %v142_v34 = vld [vmem:[%s1202_s3] sm:$0xff] }
  0x3a   :  { %v120_v21 = vadd.f32 %v119_v17, %v118_v16  ;;  %v123_v26 = vsel %vm103_vm0, %v101_v14, 0.0  ;;  %v127_v27 = vadd.f32 %v126_v24, %v125_v23  ;;  %v128_v28 = vsel %vm103_vm0, %v100_v13, 0.0  ;;  %840 = vmatprep.mubr.msk.f32.mxu0 %vm103_vm0, %v142_v34  ;;  %v231_v47 = vld [vmem:[%s1205_s6] sm:$0xff]  ;;  %v232_v48 = vld [vmem:[%s1205_s6 + $0x8] sm:$0xff]  ;;  %v73_v52 = vld [vmem:[#allocation2 + $0x10] sm:$0xff] }
  0x3b   :  { %v130_v29 = vsel %vm103_vm0, %v102_v15, 0.0  ;;  %v338_v31 = vmul.f32 %v330_v18, %v330_v18  ;;  %v339_v32 = vmul.f32 %v331_v19, %v331_v19  ;;  %v340_v33 = vmul.f32 %v332_v20, %v332_v20  ;;  %v71_v50 = vld [vmem:[#allocation2] sm:$0xff]  ;;  %v72_v51 = vld [vmem:[#allocation2 + $0x8] sm:$0xff]  ;;  %v74_v53 = vld [vmem:[#allocation2 + $0x18] sm:$0xff] }
  0x3c   :  { %v122_v30 = vadd.f32 %v121_v22, %v120_v21  ;;  %v129_v35 = vadd.f32 %v128_v28, %v127_v27  ;;  %v341_v36 = vmul.f32 %v333_v25, %v333_v25  ;;  %v883_v49 = vpack.c.bf16 %v232_v48, %v231_v47  ;;  %v326_v54 = vld [vmem:[#allocation4] sm:$0xff]  ;;  %v327_v55 = vld [vmem:[#allocation4 + $0x8] sm:$0xff]  ;;  %v328_v2 = vld [vmem:[#allocation4 + $0x10] sm:$0xff] }
  0x3d   :  { %v350_v38 = vsel %vm342_vm1, %v338_v31, 0.0  ;;  %v351_v39 = vsel %vm342_vm1, %v339_v32, 0.0  ;;  %v353_v40 = vsel %vm342_vm1, %v340_v33, 0.0  ;;  %v75_v56 = vld [vmem:[#allocation2 + $0x20] sm:$0xff]  ;;  %v76_v57 = vld [vmem:[#allocation2 + $0x28] sm:$0xff]  ;;  %v87_v58 = vmul.f32 %v71_v50, %v71_v50  ;;  %v77_v7 = vld [vmem:[#allocation2 + $0x30] sm:$0xff] }
  0x3e   :  { %v124_v37 = vadd.f32 %v123_v26, %v122_v30  ;;  %v131_v41 = vadd.f32 %v130_v29, %v129_v35  ;;  %v352_v42 = vadd.f32 %v351_v39, %v350_v38  ;;  %v355_v43 = vsel %vm342_vm1, %v341_v36, 0.0  ;;  %884 = vmatprep.subr.bf16.mxu1 %v883_v49  ;;  %v78_v8 = vld [vmem:[#allocation2 + $0x38] sm:$0xff]  ;;  %v143_v39 = vld [vmem:[%s1202_s3 + $0x8] sm:$0xff] }
  0x3f   :  { %886 = vmatpush3.bf16.msra.mxu1 %v883_v49  ;;  %v88_v59 = vmul.f32 %v72_v51, %v72_v51  ;;  %v89_v60 = vmul.f32 %v73_v52, %v73_v52  ;;  %v90_v61 = vmul.f32 %v74_v53, %v74_v53  ;;  %v334_v62 = vmul.f32 %v326_v54, %v326_v54  ;;  %v329_v14 = vld [vmem:[#allocation4 + $0x18] sm:$0xff] }
  0x40   :  { %v897_v44 = vpack.i.bf16 %v131_v41, %v124_v37  ;;  %v354_v45 = vadd.f32 %v353_v40, %v352_v42  ;;  %v335_v63 = vmul.f32 %v327_v55, %v327_v55  ;;  %v91_v0 = vmul.f32 %v75_v56, %v75_v56  ;;  %v362_v40 = vld [vmem:[%s1203_s4] sm:$0xff]  ;;  %v363_v41 = vld [vmem:[%s1203_s4 + $0x8] sm:$0xff]  ;;  %v555_v47 = vld [vmem:[%s1201_s2 + $0x18] sm:$0xf] }
  0x41   :  { %v92_v1 = vmul.f32 %v76_v57, %v76_v57  ;;  %v104_v3 = vsel %vm103_vm0, %v87_v58, 0.0  ;;  %v105_v4 = vsel %vm103_vm0, %v89_v60, 0.0  ;;  %v111_v5 = vsel %vm103_vm0, %v88_v59, 0.0  ;;  %v451_v42 = vld [vmem:[#allocation6] sm:$0xff]  ;;  %v556_v51 = vld [vmem:[%s1201_s2 + $0x1c] sm:$0xf] }
  0x42   :  { %898 = vrot.lane.b32.xlu0 %v897_v44, %s977_s26  ;;  %v356_v46 = vadd.f32 %v355_v43, %v354_v45  ;;  %v112_v6 = vsel %vm103_vm0, %v90_v61, 0.0  ;;  %v336_v9 = vmul.f32 %v328_v2, %v328_v2  ;;  %v343_v10 = vsel %vm342_vm1, %v334_v62, 0.0  ;;  %v553_v43 = vld [vmem:[%s1201_s2 + $0x10] sm:$0xf]  ;;  %v554_v44 = vld [vmem:[%s1201_s2 + $0x14] sm:$0xf] }
  0x43   :  { %v344_v11 = vsel %vm342_vm1, %v335_v63, 0.0  ;;  %v106_v12 = vadd.f32 %v105_v4, %v104_v3  ;;  %v113_v13 = vadd.f32 %v112_v6, %v111_v5  ;;  %v93_v15 = vmul.f32 %v77_v7, %v77_v7  ;;  %v549_v62 = vld [vmem:[%s1201_s2] sm:$0xf]  ;;  %v550_v63 = vld [vmem:[%s1201_s2 + $0x4] sm:$0xf] }
  0x44   :  { %358 = vrot.lane.b32.xlu1 %v356_v46, %s975_s22  ;;  %v94_v16 = vmul.f32 %v78_v8, %v78_v8  ;;  %v107_v17 = vsel %vm103_vm0, %v91_v0, 0.0  ;;  %v114_v18 = vsel %vm103_vm0, %v92_v1, 0.0  ;;  %v345_v19 = vadd.f32 %v344_v11, %v343_v10  ;;  %v551_v2 = vld [vmem:[%s1201_s2 + $0x8] sm:$0xf]  ;;  %v552_v6 = vld [vmem:[%s1201_s2 + $0xc] sm:$0xf] }
  0x45   :  { %v337_v20 = vmul.f32 %v329_v14, %v329_v14  ;;  %v346_v21 = vsel %vm342_vm1, %v336_v9, 0.0  ;;  %v108_v22 = vadd.f32 %v107_v17, %v106_v12  ;;  %v115_v23 = vadd.f32 %v114_v18, %v113_v13  ;;  %v586_v13 = vld [vmem:[%s1204_s5] sm:$0xff] }
  0x46   :  { %v109_v24 = vsel %vm103_vm0, %v93_v15, 0.0  ;;  %v116_v25 = vsel %vm103_vm0, %v94_v16, 0.0  ;;  %v347_v26 = vadd.f32 %v346_v21, %v345_v19  ;;  %v561_v45 = vmul.f32 %v553_v43, %v553_v43  ;;  %v587_v19 = vld [vmem:[%s1204_s5 + $0x8] sm:$0xff]  ;;  %v679_v21 = vld [vmem:[%s1207_s8] sm:$0xf]  ;;  %s981_s5 = smov 124  }
  0x47   :  { %v348_v27 = vsel %vm342_vm1, %v337_v20, 0.0  ;;  %v110_v28 = vadd.f32 %v109_v24, %v108_v22  ;;  %v117_v29 = vadd.f32 %v116_v25, %v115_v23  ;;  %v562_v46 = vmul.f32 %v554_v44, %v554_v44 }
  0x48   :  { %v349_v33 = vadd.f32 %v348_v27, %v347_v26  ;;  %v563_v48 = vmul.f32 %v555_v47, %v555_v47  ;;  %v573_v49 = vsel %vm565_vm2, %v561_v45, 0.0  ;;  %v564_v53 = vmul.f32 %v556_v51, %v556_v51 }
  0x49   :  { %v574_v50 = vsel %vm565_vm2, %v562_v46, 0.0  ;;  %v557_v0 = vmul.f32 %v549_v62, %v549_v62  ;;  %v558_v1 = vmul.f32 %v550_v63, %v550_v63  ;;  %v559_v3 = vmul.f32 %v551_v2, %v551_v2 }
  0x4a   :  { %v575_v52 = vadd.f32 %v574_v50, %v573_v49  ;;  %v576_v54 = vsel %vm565_vm2, %v563_v48, 0.0  ;;  %v578_v56 = vsel %vm565_vm2, %v564_v53, 0.0  ;;  %v560_v8 = vmul.f32 %v552_v6, %v552_v6 }
  0x4b   :  { %v566_v4 = vsel %vm565_vm2, %v557_v0, 0.0  ;;  %v567_v5 = vsel %vm565_vm2, %v558_v1, 0.0  ;;  %v569_v9 = vsel %vm565_vm2, %v559_v3, 0.0  ;;  %vm594_vm4 = vcmask 1043456  }
  0x4c   :  { %v577_v55 = vadd.f32 %v576_v54, %v575_v52  ;;  %v568_v7 = vadd.f32 %v567_v5, %v566_v4  ;;  %v571_v11 = vsel %vm565_vm2, %v560_v8, 0.0 }
  0x4e   :  { %v579_v59 = vadd.f32 %v578_v56, %v577_v55  ;;  %v570_v10 = vadd.f32 %v569_v9, %v568_v7 }
  0x50   :  { %v572_v15 = vadd.f32 %v571_v11, %v570_v10 }
  0xb4   :  { %v899_v30 = vpop.permute.xlu0 %898 }
  0xb5   :  { %v901_v31 = vunpack.i.h.bf16 %v899_v30  ;;  %v900_v32 = vunpack.i.l.bf16 %v899_v30 }
  0xb6   :  { %v359_v34 = vpop.permute.xlu1 %358 }
  0xb7   :  { %v140_v35 = vsel %vm103_vm0, %v110_v28, %v900_v32  ;;  %v141_v36 = vsel %vm103_vm0, %v117_v29, %v901_v31  ;;  %v361_v38 = vsel %vm342_vm1, %v349_v33, %v359_v34 }
  0xb8   :  { %v879_v37 = vpack.c.bf16 %v141_v36, %v140_v35 }
  0xba   :  { %880 = vmatprep.subr.bf16.mxu0 %v879_v37 }
  0xbb   :  { %882 = vmatpush3.bf16.msra.mxu0 %v879_v37 }
  0xbc   :  { %853 = vmatprep.subr.mxu0 %v361_v38 }
  0xbe   :  { %841 = vmatmul.mubr.msk.f32.vlgmr.msra.gmra.mrb[0].mxu0 %vm103_vm0, %v143_v39 }
  0xbf   :  { %854 = vmatpush3.msra.mxu0 %v361_v38  ;;  %855 = vmatprep.mubr.msk.f32.mxu0 %vm342_vm1, %v362_v40 }
  0xc0   :  { %858 = vmatprep.subr.mxu0 %v451_v42 }
  0xc2   :  { %856 = vmatmul.mubr.msk.f32.vlgmr.msra.gmra.mrb[2].mxu0 %vm342_vm1, %v363_v41 }
  0xc3   :  { %859 = vmatpush3.msra.mxu0 %v451_v42 }
 0x191   :  { %v842_v57 = vpop.f32.mrb[0].mxu0 }
 0x192   :  { %229 = vrot.lane.b32.xlu1 %v842_v57, %s978_s20  ;;  %v216_v58 = vpop.f32.mrb[1].mxu0 }
 0x193   :  { %227 = vrot.lane.b32.xlu0 %v216_v58, %s978_s20  ;;  %847 = vmatprep.mubr.msk.f32.mxu1 %vm103_vm0, %v216_v58 }
 0x194   :  { %848 = vmatmul.mubr.msk.f32.vlgmr.msra.gmra.mrb[0].mxu1 %vm103_vm0, %v842_v57 }
 0x195   :  { %v857_v60 = vpop.f32.mrb[2].mxu0 }
 0x196   :  { %v436_v61 = vpop.f32.mrb[3].mxu0 }
 0x197   :  { %581 = vrot.lane.b32.xlu0 %v579_v59, %s979_s23  ;;  %860 = vmatprep.mubr.msk.f32.mxu0 %vm342_vm1, %v436_v61 }
 0x198   :  { %861 = vmatmul.mubr.msk.f32.vlgmr.msra.gmra.mrb[4].mxu0 %vm342_vm1, %v857_v60  ;;  %447 = vrot.lane.b32.xlu1 %v436_v61, %s980_s24 }
 0x19b   :  { %449 = vrot.lane.b32.xlu0 %v857_v60, %s980_s24 }
 0x204   :  { %v230_v14 = vpop.permute.xlu1 %229 }
 0x205   :  { %v228_v12 = vpop.permute.xlu0 %227 }
 0x206   :  { %850 = vmatprep.mubr.msk.f32.mxu1 %vm103_vm0, %v228_v12 }
 0x207   :  { %851 = vmatmul.mubr.msk.f32.gmra.mrb[2].mxu1 %vm103_vm0, %v230_v14 }
 0x208   :  { %868 = vmatprep.mubr.msk.f32.mxu1 %vm584_vm3, %v586_v13 }
 0x209   :  { %v582_v16 = vpop.permute.xlu0 %581 }
 0x20a   :  { %v585_v17 = vsel %vm584_vm3, %v572_v15, %v582_v16  ;;  %v448_v18 = vpop.permute.xlu1 %447 }
 0x20b   :  { %866 = vmatprep.subr.msk.mxu1 %vm594_vm4, %v585_v17  ;;  %863 = vmatprep.mubr.msk.f32.mxu0 %vm342_vm1, %v448_v18 }
 0x20c   :  { %867 = vmatpush3.msk.msra.mxu1 %vm594_vm4, %v585_v17 }
 0x20d   :  { %v450_v20 = vpop.permute.xlu0 %449  ;;  %869 = vmatmul.mubr.msk.f32.vlgmr.msra.gmra.mrb[4].mxu1 %vm584_vm3, %v587_v19  ;;  %871 = vmatprep.subr.msk.mxu1 %vm594_vm4, %v679_v21 }
 0x20e   :  { %864 = vmatmul.mubr.msk.f32.gmra.mrb[6].mxu0 %vm342_vm1, %v450_v20  ;;  %872 = vmatpush3.msk.msra.mxu1 %vm594_vm4, %v679_v21 }
 0x267   :  { %v849_v22 = vpop.f32.mrb[0].mxu1 }
 0x268   :  { %v307_v23 = vpop.f32.mrb[1].mxu1 }
 0x26b   :  { %v862_v24 = vpop.f32.mrb[4].mxu0 }
 0x26c   :  { %v546_v25 = vmul.f32 %v862_v24, %v849_v22  ;;  %v526_v26 = vpop.f32.mrb[5].mxu0 }
 0x26d   :  { %v545_v27 = vmul.f32 %v526_v26, %v307_v23 }
 0x2da   :  { %v852_v28 = vpop.f32.mrb[2].mxu1 }
 0x2db   :  { %v317_v29 = vpop.f32.mrb[3].mxu1 }
 0x2e0   :  { %v870_v30 = vpop.f32.mrb[4].mxu1 }
 0x2e1   :  { %v865_v31 = vpop.f32.mrb[6].mxu0  ;;  %v664_v32 = vpop.f32.mrb[5].mxu1  ;;  %677 = vrot.lane.b32.xlu0 %v870_v30, %s981_s5 }
 0x2e2   :  { %v548_v33 = vmul.f32 %v865_v31, %v852_v28  ;;  %v536_v34 = vpop.f32.mrb[7].mxu0  ;;  %675 = vrot.lane.b32.xlu1 %v664_v32, %s981_s5  ;;  %873 = vmatprep.mubr.msk.f32.mxu1 %vm584_vm3, %v664_v32 }
 0x2e3   :  { %v547_v35 = vmul.f32 %v536_v34, %v317_v29  ;;  %874 = vmatmul.mubr.msk.f32.vlgmr.msra.gmra.mrb[6].mxu1 %vm584_vm3, %v870_v30 }
 0x353   :  { %v678_v37 = vpop.permute.xlu0 %677 }
 0x354   :  { %v676_v36 = vpop.permute.xlu1 %675 }
 0x355   :  { %876 = vmatprep.mubr.msk.f32.mxu1 %vm584_vm3, %v676_v36 }
 0x356   :  { %877 = vmatmul.mubr.msk.f32.gmra.mrb[8].mxu1 %vm584_vm3, %v678_v37 }
 0x3b6   :  { %v875_v38 = vpop.f32.mrb[6].mxu1 }
 0x3b7   :  { %v777_v39 = vmul.f32 %v875_v38, %v546_v25  ;;  %v757_v40 = vpop.f32.mrb[7].mxu1 }
 0x3b8   :  { %v776_v41 = vmul.f32 %v757_v40, %v545_v27 }
 0x3b9   :  { %781 = vst.msk [vmem:[%s1208_s9 + $0x8] sm:$0xff] %vm103_vm0, %v777_v39 }
 0x3ba   :  { %780 = vst.msk [vmem:[%s1208_s9] sm:$0xff] %vm103_vm0, %v776_v41 }
 0x429   :  { %v878_v42 = vpop.f32.mrb[8].mxu1 }
 0x42a   :  { %v779_v43 = vmul.f32 %v878_v42, %v548_v33  ;;  %v767_v44 = vpop.f32.mrb[9].mxu1 }
 0x42b   :  { %v778_v45 = vmul.f32 %v767_v44, %v547_v35 }
 0x42c   :  { %783 = vst.msk [vmem:[%s1208_s9 + $0x18] sm:$0xff] %vm103_vm0, %v779_v43 }
 0x42d   :  { %782 = vst.msk [vmem:[%s1208_s9 + $0x10] sm:$0xff] %vm103_vm0, %v778_v45 }
 0x42e   :  { %788 = vsyncpa [#allocation3], 1 }
 0x42f   :  { %789 = vsyncpa [#allocation5], 1 }

</bundles_post_ra>
